<compile_context>
chip_gen: v5e
topology: v5e:2x2
jax: 0.10.0
libtpu: 0.0.40
codegen_flags: <defaults>
</compile_context>

<pallas_src>
import jax
import jax.numpy as jnp
from jax.experimental import pallas as pl
from jax.experimental.pallas import tpu as pltpu


def _kl_loss_tile_kernel(pred_ref, label_ref, out_ref):
    """One (TILE_B, C) tile -> scalar partial sum of per-row KL divergences."""
    pred = pred_ref[...].astype(jnp.float32)
    label = label_ref[...].astype(jnp.float32)

    # log_softmax(prediction, axis=1)
    m1 = jnp.max(pred, axis=1, keepdims=True)
    z1 = pred - m1
    lse1 = jnp.log(jnp.sum(jnp.exp(z1), axis=1, keepdims=True))
    logp1 = z1 - lse1                                  # [tile_b, C]

    # softmax(label * 10, axis=1), folded into the KL sum so the 1/s2 divide
    # is per-row instead of per-element and no full-size p2/logp2 temporaries
    # are materialized:
    #   sum_c p2*(logp2 - logp1) = (sum_c e2*(z2 - logp1)) / s2 - log(s2)
    l10 = label * 10.0
    m2 = jnp.max(l10, axis=1, keepdims=True)
    z2 = l10 - m2
    e2 = jnp.exp(z2)
    s2 = jnp.sum(e2, axis=1, keepdims=True)            # [tile_b, 1]
    num = jnp.sum(e2 * (z2 - logp1), axis=1, keepdims=True)  # [tile_b, 1]
    row_kl = num / s2 - jnp.log(s2)                    # [tile_b, 1]

    # Partial sum for this tile (scale by 1/C happens in the wrapper with the
    # full logical C, NOT the in-kernel block shape).
    out_ref[0, 0] = jnp.sum(row_kl)


def _choose_tile_b(B: int, C: int) -> int:
    """Pick a batch tile: ~2 MiB of f32 per input tile, multiple of 8."""
    target_elems = (2 * 1024 * 1024) // 4              # ~2 MiB of f32
    tile_b = max(8, (target_elems // max(C, 1)) // 8 * 8)
    tile_b = min(tile_b, 1024)
    if tile_b >= B:
        return B                                       # single full-array tile
    return tile_b


def kl_loss(prediction: jax.Array, label: jax.Array, *, tile_b: int | None = None) -> jax.Array:
    """Pallas implementation of KLLoss.forward. Returns a scalar float32."""
    assert prediction.shape == label.shape and prediction.ndim == 2
    B, C = prediction.shape
    if tile_b is None:
        tile_b = _choose_tile_b(B, C)

    # Pad the batch to a multiple of tile_b with zero rows. Zero rows give
    # KL(uniform || uniform) == 0, so the total sum is unaffected.
    num_tiles = pl.cdiv(B, tile_b)
    b_pad = num_tiles * tile_b
    if b_pad != B:
        pad = ((0, b_pad - B), (0, 0))
        prediction = jnp.pad(prediction, pad)
        label = jnp.pad(label, pad)

    partials = pl.pallas_call(
        _kl_loss_tile_kernel,
        out_shape=jax.ShapeDtypeStruct((num_tiles, 1), jnp.float32),
        grid_spec=pltpu.PrefetchScalarGridSpec(
            num_scalar_prefetch=0,
            grid=(num_tiles,),
            in_specs=[
                pl.BlockSpec((tile_b, C), lambda i: (i, 0)),
                pl.BlockSpec((tile_b, C), lambda i: (i, 0)),
            ],
            out_specs=pl.BlockSpec((1, 1), lambda i: (i, 0),
                                   memory_space=pltpu.SMEM),
        ),
        compiler_params=pltpu.CompilerParams(
            # Independent per-tile partials -> shard tiles across TCs on v7x.
            dimension_semantics=("parallel",),
        ),
    )(prediction, label)

    # reduction='mean' over all B*C elements, then * batch_size  ==  sum / C.
    # Use the full logical C as a trace-time constant.
    return jnp.sum(partials) * jnp.float32(1.0 / C)


def _kl_loss_ref(prediction, label):
    """Pure-JAX reference for validation."""
    logp1 = jax.nn.log_softmax(prediction.astype(jnp.float32), axis=1)
    p2 = jax.nn.softmax(label.astype(jnp.float32) * 10.0, axis=1)
    logp2 = jax.nn.log_softmax(label.astype(jnp.float32) * 10.0, axis=1)
    pointwise = jnp.where(p2 > 0.0, p2 * (logp2 - logp1), 0.0)
    return jnp.mean(pointwise) * prediction.shape[0]


if __name__ == "__main__":
    key = jax.random.PRNGKey(0)

    # Module-consistent small shape: batch of 8 logit rows over 32 classes.
    B, C = 8, 32
    kp, kl = jax.random.split(key)
    prediction = jax.random.normal(kp, (B, C), dtype=jnp.float32)
    label = jax.random.uniform(kl, (B, C), dtype=jnp.float32)

    loss = jax.block_until_ready(kl_loss(prediction, label))
    ref = jax.block_until_ready(_kl_loss_ref(prediction, label))
    assert jnp.allclose(loss, ref, rtol=1e-4, atol=1e-5), (loss, ref)

    # Second (still small) case forcing the tiled, padded, multi-step grid
    # path: B=136 with tile_b=64 -> 3 tiles, 56 zero-padded rows.
    B2, C2 = 136, 256
    kp2, kl2 = jax.random.split(kp)
    prediction2 = jax.random.normal(kp2, (B2, C2), dtype=jnp.float32)
    label2 = jax.random.uniform(kl2, (B2, C2), dtype=jnp.float32)

    loss2 = jax.block_until_ready(kl_loss(prediction2, label2, tile_b=64))
    ref2 = jax.block_until_ready(_kl_loss_ref(prediction2, label2))
    assert jnp.allclose(loss2, ref2, rtol=1e-4, atol=1e-5), (loss2, ref2)

    print("KERNEL_OK")
</pallas_src>

<mosaic_0001>
module attributes {stable_mosaic.version = 11 : i64} {
  func.func @_kl_loss_tile_kernel(%arg0: i32, %arg1: memref<8x32xf32, #tpu.memory_space<vmem>>, %arg2: memref<8x32xf32, #tpu.memory_space<vmem>>, %arg3: memref<1x1xf32, #tpu.memory_space<smem>>) attributes {dimension_semantics = [#tpu.dimension_semantics<parallel>], iteration_bounds = array<i64: 1>, scalar_prefetch = 0 : i64, scratch_operands = 0 : i64, tpu.core_type = #tpu.core_type<tc>, window_params = [{transform_indices = @transform_0, window_bounds = array<i64: 8, 32>}, {transform_indices = @transform_1, window_bounds = array<i64: 8, 32>}, {transform_indices = @transform_2, window_bounds = array<i64: 1, 1>}]} {
    %c0 = arith.constant 0 : index
    %c0_0 = arith.constant 0 : index
    %0 = vector.load %arg1[%c0, %c0_0] : memref<8x32xf32, #tpu.memory_space<vmem>>, vector<8x32xf32>
    %c0_1 = arith.constant 0 : index
    %c0_2 = arith.constant 0 : index
    %1 = vector.load %arg2[%c0_1, %c0_2] : memref<8x32xf32, #tpu.memory_space<vmem>>, vector<8x32xf32>
    %cst = arith.constant dense<0xFF800000> : vector<8xf32>
    %2 = vector.multi_reduction <maximumf>, %0, %cst [1] : vector<8x32xf32> to vector<8xf32>
    %3 = vector.shape_cast %2 : vector<8xf32> to vector<8x1xf32>
    %4 = vector.broadcast %3 : vector<8x1xf32> to vector<8x32xf32>
    %5 = arith.subf %0, %4 : vector<8x32xf32>
    %6 = math.exp %5 : vector<8x32xf32>
    %cst_3 = arith.constant dense<0.000000e+00> : vector<8xf32>
    %7 = vector.multi_reduction <add>, %6, %cst_3 [1] : vector<8x32xf32> to vector<8xf32>
    %8 = vector.shape_cast %7 : vector<8xf32> to vector<8x1xf32>
    %9 = math.log %8 : vector<8x1xf32>
    %10 = vector.broadcast %9 : vector<8x1xf32> to vector<8x32xf32>
    %11 = arith.subf %5, %10 : vector<8x32xf32>
    %cst_4 = arith.constant 1.000000e+01 : f32
    %12 = vector.broadcast %cst_4 : f32 to vector<8x32xf32>
    %13 = arith.mulf %1, %12 : vector<8x32xf32>
    %cst_5 = arith.constant dense<0xFF800000> : vector<8xf32>
    %14 = vector.multi_reduction <maximumf>, %13, %cst_5 [1] : vector<8x32xf32> to vector<8xf32>
    %15 = vector.shape_cast %14 : vector<8xf32> to vector<8x1xf32>
    %16 = vector.broadcast %15 : vector<8x1xf32> to vector<8x32xf32>
    %17 = arith.subf %13, %16 : vector<8x32xf32>
    %18 = math.exp %17 : vector<8x32xf32>
    %cst_6 = arith.constant dense<0.000000e+00> : vector<8xf32>
    %19 = vector.multi_reduction <add>, %18, %cst_6 [1] : vector<8x32xf32> to vector<8xf32>
    %20 = vector.shape_cast %19 : vector<8xf32> to vector<8x1xf32>
    %21 = arith.subf %17, %11 : vector<8x32xf32>
    %22 = arith.mulf %18, %21 : vector<8x32xf32>
    %cst_7 = arith.constant dense<0.000000e+00> : vector<8xf32>
    %23 = vector.multi_reduction <add>, %22, %cst_7 [1] : vector<8x32xf32> to vector<8xf32>
    %24 = vector.shape_cast %23 : vector<8xf32> to vector<8x1xf32>
    %25 = arith.divf %24, %20 : vector<8x1xf32>
    %26 = math.log %20 : vector<8x1xf32>
    %27 = arith.subf %25, %26 : vector<8x1xf32>
    %28 = vector.shape_cast %27 : vector<8x1xf32> to vector<1x8x1xf32>
    %cst_8 = arith.constant dense<0.000000e+00> : vector<1xf32>
    %29 = vector.multi_reduction <add>, %28, %cst_8 [1, 2] : vector<1x8x1xf32> to vector<1xf32>
    %30 = vector.shape_cast %29 : vector<1xf32> to vector<1x1x1xf32>
    %31 = vector.extract %30[0, 0, 0] : f32 from vector<1x1x1xf32>
    %c0_9 = arith.constant 0 : index
    %c0_10 = arith.constant 0 : index
    %32 = memref.load %arg3[%c0_9, %c0_10] : memref<1x1xf32, #tpu.memory_space<smem>>
    memref.store %31, %arg3[%c0_9, %c0_10] : memref<1x1xf32, #tpu.memory_space<smem>>
    return
  }
  func.func @transform_0(%arg0: i32) -> (i32, i32) {
    %c0_i32 = arith.constant 0 : i32
    %c0_i32_0 = arith.constant 0 : i32
    return %arg0, %c0_i32 : i32, i32
  }
  func.func @transform_1(%arg0: i32) -> (i32, i32) {
    %c0_i32 = arith.constant 0 : i32
    %c0_i32_0 = arith.constant 0 : i32
    return %arg0, %c0_i32 : i32, i32
  }
  func.func @transform_2(%arg0: i32) -> (i32, i32) {
    %c0_i32 = arith.constant 0 : i32
    %c0_i32_0 = arith.constant 0 : i32
    return %arg0, %c0_i32 : i32, i32
  }
}

</mosaic_0001>

<bundles_post_ra>
// kernel: tpu_custom_call.1
= control target key start
LH: loop header
LB: loop body
LE: loop exit
PB: predicated region body
PF: predicated region fallthrough
CT: control target
= control target key end

     0   :  { %7 = vsyncpa [#allocation3], 0  ;;  %s231_s0 = inlined_call_operand.hbm [shape: f32[8,32], index: 0, kind: input, shape index: {}]   ;;  %s232_s1 = inlined_call_operand.hbm [shape: f32[8,32], index: 1, kind: input, shape index: {}]   ;;  %s233_s2 = inlined_call_operand.hbm [shape: f32[1,1], index: 2, kind: output, shape index: {}]  }
   0x1   :  { %8 = vsyncpa [#allocation6], 0 }
   0x2   :  { %9 = vsyncpa [#allocation4], 0  ;;  %s15_s11 = sshll.u32 %s231_s0, 4  ;;  %s199_s12 = smov [#allocation2]   ;;  %s16_s11 = int_to_ptr.hbm [resolvable:$true] %s15_s11 }
   0x3   :  { %s17_s13 = sshll.u32 %s199_s12, 4  ;;  %s26_s16 = sshll.u32 %s232_s1, 4  ;;  %s18_s13 = int_to_ptr.vmem [resolvable:$true] %s17_s13  ;;  %s27_s16 = int_to_ptr.hbm [resolvable:$true] %s26_s16 }
   0x4   :  { %20 = dma.hbm_to_vmem [thread:$0]  %s16_s11, 128, %s18_s13, [#allocation3]  }
   0x5   :  { %s200_s17 = smov [#allocation5]  }
   0x6   :  { %s28_s18 = sshll.u32 %s200_s17, 4  ;;  %s29_s18 = int_to_ptr.vmem [resolvable:$true] %s28_s18 }
   0x7   :  { %31 = dma.hbm_to_vmem [thread:$0]  %s27_s16, 128, %s29_s18, [#allocation6]  }
   0x8   :  { %193 = dma.done.wait [#allocation3], 128  }
   0x9   :  { %194 = vsyncadd [#allocation3], 4294967168 }
   0xa   :  { %195 = dma.done.wait [#allocation6], 128  }
   0xb   :  { %196 = vsyncadd [#allocation6], 4294967168  ;;  %vm42_vm0 = vcmask 261120   ;;  %v40_v0 = vld [vmem:[#allocation2] sm:$0xff]  ;;  %v41_v1 = vld [vmem:[#allocation5] sm:$0xff]  ;;  %vm88_vm5 = vcmask 7168  }
   0xc   :  { %v43_v2 = vsel %vm42_vm0, %v40_v0, -inf  ;;  %v55_v3 = vmul.f32 10.0, %v41_v1  ;;  %s106_s19 = sshll.u32 %s233_s2, 4  ;;  %s201_s21 = smov [#allocation7]   ;;  %s107_s19 = int_to_ptr.hbm [resolvable:$true] %s106_s19 }
   0xd   :  { %44 = vmax.xlane.f32.xlu0 %v43_v2 }
   0xe   :  { %v56_v4 = vsel %vm42_vm0, %v55_v3, -inf }
  0x15   :  { %57 = vmax.xlane.f32.xlu0 %v56_v4 }
  0x80   :  { %v45_v5 = vpop.xlane.xlu0 %44 }
  0x81   :  { %v46_v6 = vsub.f32 %v40_v0, %v45_v5 }
  0x83   :  { %v47_v7 = vmul.f32 1.442695, %v46_v6 }
  0x85   :  { %123 = vpow2.f32 %v47_v7 }
  0x88   :  { %v58_v8 = vpop.xlane.xlu0 %57 }
  0x89   :  { %v59_v9 = vsub.f32 %v55_v3, %v58_v8 }
  0x8b   :  { %v124_v10 = vpop.eup %123  ;;  %v60_v11 = vmul.f32 1.442695, %v59_v9 }
  0x8c   :  { %v49_v12 = vsel %vm42_vm0, %v124_v10, 0.0 }
  0x8d   :  { %50 = vadd.xlane.f32.xlu1 %v49_v12  ;;  %125 = vpow2.f32 %v60_v11 }
  0x93   :  { %v126_v13 = vpop.eup %125 }
  0x94   :  { %v62_v14 = vsel %vm42_vm0, %v126_v13, 0.0 }
  0x95   :  { %63 = vadd.xlane.f32.xlu1 %v62_v14 }
 0x100   :  { %v51_v15 = vpop.xlane.xlu1 %50 }
 0x101   :  { %127 = vlog2.f32 %v51_v15 }
 0x107   :  { %v128_v16 = vpop.eup %127 }
 0x108   :  { %v53_v17 = vmul.f32 0.6931472, %v128_v16  ;;  %v64_v22 = vpop.xlane.xlu1 %63 }
 0x109   :  { %129 = vrcp.f32 %v64_v22  ;;  %vm75_vm1 = vweird.f32 %v64_v22  ;;  %v81_v27 = vand.u32 2147483648, %v64_v22  ;;  %v79_v29 = vand.u32 2147483647, %v64_v22 }
 0x10a   :  { %v54_v18 = vsub.f32 %v46_v6, %v53_v17  ;;  %131 = vlog2.f32 %v64_v22 }
 0x10b   :  { %v82_v30 = vor.u32 1.1754944e-38, %v81_v27  ;;  %vm80_vm4 = vcmp.eq.f32.partialorder %v79_v29, 8.507059e+37 }
 0x10c   :  { %v65_v19 = vsub.f32 %v59_v9, %v54_v18 }
 0x10e   :  { %v66_v20 = vmul.f32 %v126_v13, %v65_v19 }
 0x10f   :  { %v130_v23 = vpop.eup %129 }
 0x110   :  { %v67_v21 = vsel %vm42_vm0, %v66_v20, 0.0  ;;  %v71_v24 = vmul.f32 %v130_v23, %v64_v22  ;;  %vm76_vm2 = vweird.f32 %v130_v23  ;;  %v132_v32 = vpop.eup %131 }
 0x111   :  { %68 = vadd.xlane.f32.xlu2 %v67_v21  ;;  %vm77_vm3 = vmor %vm75_vm1, %vm76_vm2  ;;  %v86_v36 = vmul.f32 0.6931472, %v132_v32 }
 0x112   :  { %v72_v25 = vsub.f32 1.0, %v71_v24 }
 0x114   :  { %v73_v26 = vmul.f32 %v130_v23, %v72_v25 }
 0x116   :  { %v74_v28 = vadd.f32 %v130_v23, %v73_v26 }
 0x118   :  { %v78_v31 = vsel %vm77_vm3, %v130_v23, %v74_v28 }
 0x119   :  { %v83_v34 = vsel %vm80_vm4, %v82_v30, %v78_v31 }
 0x184   :  { %v69_v33 = vpop.xlane.xlu2 %68 }
 0x185   :  { %v84_v35 = vmul.f32 %v83_v34, %v69_v33 }
 0x187   :  { %v87_v37 = vsub.f32 %v84_v35, %v86_v36 }
 0x189   :  { %v89_v38 = vsel %vm88_vm5, %v87_v37, 0.0 }
 0x18a   :  { %90 = vadd.xlane.f32.xlu2 %v89_v38 }
 0x1fd   :  { %v91_v39 = vpop.xlane.xlu2 %90 }
 0x1fe   :  { %v92_v40 = vrot.slane %v91_v39, 4 }
 0x200   :  { %v93_v41 = vadd.f32 %v92_v40, %v91_v39 }
 0x202   :  { %v94_v42 = vrot.slane %v93_v41, 2 }
 0x204   :  { %v95_v43 = vadd.f32 %v94_v42, %v93_v41 }
 0x206   :  { %v96_v44 = vrot.slane %v95_v43, 1 }
 0x208   :  { %v97_v45 = vadd.f32 %v96_v44, %v95_v43 }
 0x20a   :  { %118 = vpush %v97_v45 }
 0x23b   :  { %s119_s20 = spop %118 }
 0x23c   :  { %100 = sst [smem:[#allocation7]] %s119_s20 }
 0x23d   :  { %109 = dma.smem_to_hbm %s201_s21, 16, %s107_s19, [#allocation4]  }
 0x23e   :  { %197 = dma.done.wait [#allocation4], 16  }
 0x23f   :  { %198 = vsyncadd [#allocation4], 4294967280 }
 0x240   :  { %114 = sfence }
 0x241   :  { %115 = vsyncpa [#allocation3], 1 }
 0x242   :  { %116 = vsyncpa [#allocation6], 1 }
 0x243   :  { %117 = vsyncpa [#allocation4], 1 }

</bundles_post_ra>
